<compile_context>
chip_gen: v7x
topology: tpu7x:2x2x1
jax: 0.10.0
libtpu: 0.0.40
codegen_flags: <defaults>
</compile_context>

<pallas_src>
import functools

import jax
import jax.numpy as jnp
from jax.experimental import pallas as pl
from jax.experimental.pallas import tpu as pltpu


def _round_up(v, m):
    return ((v + m - 1) // m) * m


def _vmem_budget_bytes():
    """Scoped-VMEM budget: ~75% of physical (96 MiB on v5e/v6e, 48 MiB on v7x)."""
    try:
        cap = int(getattr(pltpu.get_tpu_info(), "vmem_capacity_bytes",
                          64 * 1024 * 1024))
    except Exception:  # conservative fallback if the query is unavailable
        cap = 64 * 1024 * 1024
    return min((cap * 3) // 4, 100 * 1024 * 1024)


def _propagate_kernel(lhat_ref, x_ref, o_ref):
    """o[tile] = L_hat[tile, :] @ x   (bf16 MXU operands, f32 accumulation)."""
    o_ref[...] = jnp.dot(lhat_ref[...], x_ref[...],
                         preferred_element_type=jnp.float32).astype(o_ref.dtype)


def _combine_kernel(lhat_ref, x_ref, t1_ref, w_ref, b_ref, *rest,
                    fin, tile_m, final_linear):
    """One ChebConv layer (+ ReLU), optionally fused with the final Linear.

    Folded basis: out = T0 @ (W0-W2) + T1 @ W1 + (L_hat @ T1) @ (2*W2) + b,
    computed as three accumulating MXU dots against static slices of the
    stacked weights (no (TM, 3*fin) concat temp in VMEM).
    """
    if final_linear:
        wl_ref, bl_ref, o_ref = rest
    else:
        (o_ref,) = rest

    # z = L_hat[tile, :] @ T1  (T1 for all nodes is a resident bf16 block).
    z = jnp.dot(lhat_ref[...], t1_ref[...], preferred_element_type=jnp.float32)

    # The row tile of T1 is already resident in VMEM -> slice it (no extra DMA).
    row0 = pl.multiple_of(pl.program_id(0) * tile_m, tile_m)
    t1_tile = t1_ref[pl.ds(row0, tile_m), :]                  # (TM, fin) bf16

    acc = jnp.dot(x_ref[...], w_ref[0:fin, :],
                  preferred_element_type=jnp.float32)
    acc += jnp.dot(t1_tile, w_ref[fin:2 * fin, :],
                   preferred_element_type=jnp.float32)
    acc += jnp.dot(z.astype(jnp.bfloat16), w_ref[2 * fin:3 * fin, :],
                   preferred_element_type=jnp.float32)

    h = jnp.maximum(acc + b_ref[...], 0.0)                    # bias + ReLU (f32)

    if final_linear:
        # F.dropout(p=0.5, training=False) is the identity in eval mode.
        logits = jnp.dot(h.astype(jnp.bfloat16), wl_ref[...],
                         preferred_element_type=jnp.float32) + bl_ref[...]
        o_ref[...] = logits.astype(o_ref.dtype)               # lane-dense f32
    else:
        o_ref[...] = h.astype(o_ref.dtype)                    # bf16 intermediate


def cheb_forward(x, adjacency, params, *, tile_m=None):
    """Full Cheb forward: conv1 -> ReLU -> conv2 -> ReLU -> dropout(eval) -> lin1."""
    N, F = x.shape
    w1, b1, w2, b2, wl, bl = params
    H = w1.shape[-1]
    C = wl.shape[-1]

    # ---- host-side prep ----------------------------------------------------
    adjacency = adjacency.astype(jnp.float32)
    deg = jnp.sum(adjacency, axis=1)
    dinv_sqrt = jnp.where(deg > 0, 1.0 / jnp.sqrt(deg), 0.0)
    # L_hat = 2L/lambda_max - I = -D^{-1/2} A D^{-1/2}   (sym norm, lambda_max=2.0)
    lhat = -(dinv_sqrt[:, None] * adjacency * dinv_sqrt[None, :])

    # Lane-dense (128) padding of all feature dims.
    Fp = _round_up(F, 128)
    Hp = _round_up(H, 128)
    Cp = _round_up(C, 128)
    feat = max(Fp, Hp)

    # Node-dim tiling: lane-aligned row tiles, sized from this chip's VMEM.
    vmem_limit = _vmem_budget_bytes()
    if tile_m is None:
        tile_m = 512 if vmem_limit >= 80 * 1024 * 1024 else 256   # v5e/v6e vs v7x
    TM = min(tile_m, _round_up(N, 128))
    # Shrink TM (instead of copying a v5e/v6e tile size) until the double-buffered
    # bf16 (TM, Np) L_hat stripe plus the resident T1/weight blocks fit the budget.
    while TM > 128:
        Np = _round_up(N, TM)
        stream = 2 * TM * Np * 2                          # double-buffered L_hat stripe
        resident = 2 * Np * feat * 2 + 8 * feat * feat * 4  # T1 (2 bufs) + params
        if stream + resident <= (vmem_limit * 7) // 10:
            break
        TM //= 2
    Np = _round_up(N, TM)
    grid = (Np // TM,)

    lhat_p = jnp.pad(lhat, ((0, Np - N), (0, Np - N))).astype(jnp.bfloat16)
    # bf16 once on the host; kernels never re-cast the resident full-width blocks.
    x_p = jnp.pad(x.astype(jnp.float32),
                  ((0, Np - N), (0, Fp - F))).astype(jnp.bfloat16)

    def pad2(w, rows, cols):
        return jnp.pad(w, ((0, rows - w.shape[0]), (0, cols - w.shape[1])))

    def fold(w_stack, fin_pad, fout_pad):
        # basis [T0, T1, L@T1]  <->  weights [W0 - W2, W1, 2*W2]
        w0, wk1, wk2 = w_stack[0], w_stack[1], w_stack[2]
        return jnp.concatenate(
            [pad2(w0 - wk2, fin_pad, fout_pad),
             pad2(wk1, fin_pad, fout_pad),
             pad2(2.0 * wk2, fin_pad, fout_pad)], axis=0).astype(jnp.bfloat16)

    wc1 = fold(w1, Fp, Hp)                          # (3*Fp, Hp) bf16
    bc1 = pad2(b1, 1, Hp).astype(jnp.float32)
    wc2 = fold(w2, Hp, Hp)                          # (3*Hp, Hp) bf16
    bc2 = pad2(b2, 1, Hp).astype(jnp.float32)
    wl_p = pad2(wl, Hp, Cp).astype(jnp.bfloat16)    # (Hp, Cp) bf16
    bl_p = pad2(bl, 1, Cp).astype(jnp.float32)

    cparams = pltpu.CompilerParams(
        dimension_semantics=("parallel",),          # shard row tiles across TCs (v7x)
        vmem_limit_bytes=vmem_limit)

    def propagate(xin):
        fin = xin.shape[-1]
        cost = pl.CostEstimate(
            flops=2 * Np * Np * fin, transcendentals=0,
            bytes_accessed=Np * Np * 2 + 2 * Np * fin * 2)
        return pl.pallas_call(
            _propagate_kernel,
            out_shape=jax.ShapeDtypeStruct((Np, fin), jnp.bfloat16),
            grid=grid,
            in_specs=[pl.BlockSpec((TM, Np), lambda i: (i, 0)),     # L_hat stripe
                      pl.BlockSpec((Np, fin), lambda i: (0, 0))],   # resident X (bf16)
            out_specs=pl.BlockSpec((TM, fin), lambda i: (i, 0)),
            compiler_params=cparams,
            cost_estimate=cost,
        )(lhat_p, xin)

    def combine(xin, t1, wc, bc, fout, out_dtype, wl_=None, bl_=None):
        fin = xin.shape[-1]
        wout = wc.shape[-1]
        final_linear = wl_ is not None
        kernel = functools.partial(_combine_kernel, fin=fin, tile_m=TM,
                                   final_linear=final_linear)
        flops = 2 * Np * Np * fin + 2 * Np * 3 * fin * wout
        byts = Np * Np * 2 + 2 * Np * fin * 2 + Np * fout * 4
        # Constant-index blocks below are resident; for very large Np consider
        # pipeline_mode=pl.Buffered(1) on them to drop the second buffer.
        in_specs = [pl.BlockSpec((TM, Np), lambda i: (i, 0)),       # L_hat stripe
                    pl.BlockSpec((TM, fin), lambda i: (i, 0)),      # T0 row tile
                    pl.BlockSpec((Np, fin), lambda i: (0, 0)),      # T1 resident (bf16)
                    pl.BlockSpec((3 * fin, wout), lambda i: (0, 0)),
                    pl.BlockSpec((1, wout), lambda i: (0, 0))]
        args = [lhat_p, xin, t1, wc, bc]
        if final_linear:
            flops += 2 * Np * wout * fout
            in_specs += [pl.BlockSpec((wout, fout), lambda i: (0, 0)),
                         pl.BlockSpec((1, fout), lambda i: (0, 0))]
            args += [wl_, bl_]
        return pl.pallas_call(
            kernel,
            out_shape=jax.ShapeDtypeStruct((Np, fout), out_dtype),
            grid=grid,
            in_specs=in_specs,
            out_specs=pl.BlockSpec((TM, fout), lambda i: (i, 0)),
            compiler_params=cparams,
            cost_estimate=pl.CostEstimate(flops=flops, transcendentals=0,
                                          bytes_accessed=byts),
        )(*args)

    # conv1 + ReLU
    t1 = propagate(x_p)                                   # T1 = L_hat @ x (bf16)
    h1 = combine(x_p, t1, wc1, bc1, Hp, jnp.bfloat16)     # relu(ChebConv1), bf16
    # conv2 + ReLU + dropout(eval, identity) + lin1 (fused)
    u1 = propagate(h1)                                    # L_hat @ h1 (bf16)
    logits_p = combine(h1, u1, wc2, bc2, Cp, jnp.float32, wl_p, bl_p)

    return logits_p[:N, :C]


def init_params(key, dim_nodes, hidden_channels, num_classes=2, K=3):
    """Deterministic synthetic init matching the module's parameter shapes."""
    ks = jax.random.split(key, 6)

    def glorot(k, shape):
        fan_in, fan_out = shape[-2], shape[-1]
        limit = jnp.sqrt(6.0 / (fan_in + fan_out))
        return jax.random.uniform(k, shape, jnp.float32, -limit, limit)

    w1 = glorot(ks[0], (K, dim_nodes, hidden_channels))          # conv1.lins[k].weight^T
    b1 = jnp.zeros((1, hidden_channels), jnp.float32)            # conv1.bias
    w2 = glorot(ks[1], (K, hidden_channels, hidden_channels))    # conv2.lins[k].weight^T
    b2 = jnp.zeros((1, hidden_channels), jnp.float32)            # conv2.bias
    wl = glorot(ks[2], (hidden_channels, num_classes))           # lin1.weight^T
    bl = jax.random.uniform(ks[3], (1, num_classes), jnp.float32,
                            -1.0 / jnp.sqrt(hidden_channels),
                            1.0 / jnp.sqrt(hidden_channels))     # lin1.bias
    return (w1, b1, w2, b2, wl, bl)


if __name__ == "__main__":
    key = jax.random.PRNGKey(0)
    k_x, k_adj, k_p = jax.random.split(key, 3)

    N = 16              # number of graph nodes
    dim_nodes = 8       # input feature dim
    hidden = 32         # hidden_channels

    x = jax.random.normal(k_x, (N, dim_nodes), jnp.float32)

    # Deterministic symmetric adjacency (no self loops), plus a ring so no isolated nodes.
    rnd = jax.random.uniform(k_adj, (N, N))
    adj = (rnd > 0.7).astype(jnp.float32)
    adj = jnp.maximum(adj, adj.T)
    ring = jnp.eye(N, k=1) + jnp.eye(N, k=-1)
    ring = ring.at[0, N - 1].set(1.0).at[N - 1, 0].set(1.0)
    adj = jnp.maximum(adj, ring)
    adj = adj * (1.0 - jnp.eye(N))

    params = init_params(k_p, dim_nodes, hidden, num_classes=2)

    out = cheb_forward(x, adj, params)
    jax.block_until_ready(out)
    assert out.shape == (N, 2) and out.dtype == jnp.float32
    print("KERNEL_OK")
</pallas_src>

<mosaic_0001>
module attributes {stable_mosaic.version = 11 : i64} {
  func.func @_propagate_kernel(%arg0: i32, %arg1: memref<128x128xbf16, #tpu.memory_space<vmem>>, %arg2: memref<128x128xbf16, #tpu.memory_space<vmem>>, %arg3: memref<128x128xbf16, #tpu.memory_space<vmem>>) attributes {dimension_semantics = [#tpu.dimension_semantics<parallel>], iteration_bounds = array<i64: 1>, scalar_prefetch = 0 : i64, scratch_operands = 0 : i64, tpu.core_type = #tpu.core_type<tc>, window_params = [{transform_indices = @transform_0, window_bounds = array<i64: 128, 128>}, {pipeline_mode = #tpu.pipeline_mode<synchronous>, transform_indices = @transform_1, window_bounds = array<i64: 128, 128>}, {transform_indices = @transform_2, window_bounds = array<i64: 128, 128>}]} {
    %c0 = arith.constant 0 : index
    %c0_0 = arith.constant 0 : index
    %0 = vector.load %arg1[%c0, %c0_0] : memref<128x128xbf16, #tpu.memory_space<vmem>>, vector<128x128xbf16>
    %c0_1 = arith.constant 0 : index
    %c0_2 = arith.constant 0 : index
    %1 = vector.load %arg2[%c0_1, %c0_2] : memref<128x128xbf16, #tpu.memory_space<vmem>>, vector<128x128xbf16>
    %cst = arith.constant dense<0.000000e+00> : vector<128x128xf32>
    %2 = tpu.matmul %0, %1, %cst {dimension_numbers = #tpu.dot_dimension_numbers<[1], [0], [0], [1], [0, 0, 1, 1], [], []>} : vector<128x128xbf16>, vector<128x128xbf16>, vector<128x128xf32> -> vector<128x128xf32>
    %3 = arith.truncf %2 : vector<128x128xf32> to vector<128x128xbf16>
    %c0_3 = arith.constant 0 : index
    %c0_4 = arith.constant 0 : index
    %4 = vector.load %arg3[%c0_3, %c0_4] : memref<128x128xbf16, #tpu.memory_space<vmem>>, vector<128x128xbf16>
    tpu.vector_store %arg3[%c0_3, %c0_4], %3 {strides = array<i32>} : memref<128x128xbf16, #tpu.memory_space<vmem>>, vector<128x128xbf16>,
    return
  }
  func.func @transform_0(%arg0: i32) -> (i32, i32) {
    %c0_i32 = arith.constant 0 : i32
    %c0_i32_0 = arith.constant 0 : i32
    return %arg0, %c0_i32 : i32, i32
  }
  func.func @transform_1(%arg0: i32) -> (i32, i32) {
    %c0_i32 = arith.constant 0 : i32
    %c0_i32_0 = arith.constant 0 : i32
    %c0_i32_1 = arith.constant 0 : i32
    return %c0_i32, %c0_i32_0 : i32, i32
  }
  func.func @transform_2(%arg0: i32) -> (i32, i32) {
    %c0_i32 = arith.constant 0 : i32
    %c0_i32_0 = arith.constant 0 : i32
    return %arg0, %c0_i32 : i32, i32
  }
}

</mosaic_0001>

<bundles_post_ra>
// kernel: tpu_custom_call.1
= control target key start
LH: loop header
LB: loop body
LE: loop exit
PB: predicated region body
PF: predicated region fallthrough
CT: control target
= control target key end

     0   :  { %7 = vsyncpa [#allocation3], 0  ;;  %s681_s0 = inlined_call_operand.hbm [shape: bf16[128,128], index: 0, kind: input, shape index: {}]   ;;  %s682_s1 = inlined_call_operand.hbm [shape: bf16[128,128], index: 1, kind: input, shape index: {}]   ;;  %s683_s2 = inlined_call_operand.hbm [shape: bf16[128,128], index: 2, kind: output, shape index: {}]  }
   0x1   :  { %8 = vsyncpa [#allocation6], 0 }
   0x2   :  { %9 = vsyncpa [#allocation4], 0  ;;  %s616_s9 = smov [#allocation2]   ;;  %s544_s13 = scalar_lea.hbm %s681_s0, 1024 }
   0x3   :  { %s15_s10 = sshll.u32 %s616_s9, 4  ;;  %p545_p0 = scmp.ne.s32.totalorder %s681_s0, %s544_s13  ;;  %s16_s10 = int_to_ptr.vmem [resolvable:$true] %s15_s10 }
   0x4   :  { %p548_p1 = scmp.lt.u32.totalorder %s544_s13, %s681_s0 }
   0x6   :  { %p550_p2 = pnand %p548_p1, %p545_p0 }
   0x8   :  { %553 = shalt.err (!%p550_p2)
}
   0x9   :  { %s554_s18 = scalar_lea.vmem %s16_s10, 1024  ;;  %p559_p4 = scmp.lt.s32.totalorder %s16_s10, %s16_s10 }
   0xa   :  { %p555_p3 = scmp.ne.s32.totalorder %s16_s10, %s554_s18  ;;  %p560_p5 = scmp.lt.s32.totalorder %s554_s18, %s554_s18 }
   0xc   :  { %p561_p6 = por %p560_p5, %p559_p4 }
   0xe   :  { %p562_p7 = pnand %p561_p6, %p555_p3 }
  0x10   :  { %565 = shalt.err (!%p562_p7)
}
  0x11   :  { %s617_s19 = smov 64   ;;  %s618_s20 = smov 4  }
  0x12   :  { %21 = dma.hbm_to_vmem [thread:$0]  %s681_s0, 1024, %s16_s10, [#allocation3], %s617_s19, %s617_s19, %s618_s20  }
  0x13   :  { %s619_s23 = smov [#allocation5]   ;;  %s566_s27 = scalar_lea.hbm %s682_s1, 1024 }
  0x14   :  { %s27_s24 = sshll.u32 %s619_s23, 4  ;;  %p567_p8 = scmp.ne.s32.totalorder %s682_s1, %s566_s27  ;;  %s28_s24 = int_to_ptr.vmem [resolvable:$true] %s27_s24 }
  0x15   :  { %p570_p9 = scmp.lt.u32.totalorder %s566_s27, %s682_s1 }
  0x17   :  { %p572_p10 = pnand %p570_p9, %p567_p8 }
  0x19   :  { %575 = shalt.err (!%p572_p10)
}
  0x1a   :  { %s576_s4 = scalar_lea.vmem %s28_s24, 1024  ;;  %p581_p12 = scmp.lt.s32.totalorder %s28_s24, %s28_s24 }
  0x1b   :  { %p577_p11 = scmp.ne.s32.totalorder %s28_s24, %s576_s4  ;;  %p582_p13 = scmp.lt.s32.totalorder %s576_s4, %s576_s4 }
  0x1d   :  { %p583_p0 = por %p582_p13, %p581_p12 }
  0x1f   :  { %p584_p1 = pnand %p583_p0, %p577_p11 }
  0x21   :  { %587 = shalt.err (!%p584_p1)
}
  0x22   :  { %33 = dma.hbm_to_vmem [thread:$0]  %s682_s1, 1024, %s28_s24, [#allocation6], %s617_s19, %s617_s19, %s618_s20  }
  0x23   :  { %610 = dma.done.wait [#allocation3], 1024  }
  0x24   :  { %611 = vsyncadd [#allocation3], 4294966272 }
  0x25   :  { %612 = dma.done.wait [#allocation6], 1024  }
  0x26   :  { %613 = vsyncadd [#allocation6], 4294966272  ;;  %v528_v0 = vld [vmem:[#allocation5] sm:$0xff]   ;;  %v529_v1 = vld [vmem:[#allocation5 + $0x8] sm:$0xff]   ;;  %s620_s1 = smov [#allocation7]  }
  0x27   :  { %475 = vmatprep.subr.bf16.mxu0 %v528_v0  ;;  %507 = vmatprep.subr.bf16.mxu1 %v528_v0  ;;  %v530_v2 = vld [vmem:[#allocation5 + $0x10] sm:$0xff]   ;;  %v531_v3 = vld [vmem:[#allocation5 + $0x18] sm:$0xff]   ;;  %v536_v4 = vld [vmem:[#allocation2] sm:$0xff]   ;;  %s351_s6 = sshll.u32 %s620_s1, 4  ;;  %s352_s6 = int_to_ptr.vmem [resolvable:$true] %s351_s6 }
  0x28   :  { %476 = vmatpush3.bf16.msra.mxu0 %v528_v0  ;;  %515 = vmatpush3.bf16.msra.mxu1 %v528_v0  ;;  %v537_v5 = vld [vmem:[#allocation2 + $0x20] sm:$0xff]   ;;  %v533_v7 = vld [vmem:[#allocation5 + $0x28] sm:$0xff]   ;;  %v534_v8 = vld [vmem:[#allocation5 + $0x30] sm:$0xff]   ;;  %s588_s7 = scalar_lea.vmem %s352_s6, 1024  ;;  %p593_p3 = scmp.lt.s32.totalorder %s352_s6, %s352_s6 }
  0x29   :  { %477 = vmatprep.subr.bf16.mxu0 %v529_v1  ;;  %508 = vmatprep.subr.bf16.mxu1 %v529_v1  ;;  %v532_v6 = vld [vmem:[#allocation5 + $0x20] sm:$0xff]   ;;  %v535_v9 = vld [vmem:[#allocation5 + $0x38] sm:$0xff]   ;;  %v538_v10 = vld [vmem:[#allocation2 + $0x8] sm:$0xff]   ;;  %p589_p2 = scmp.ne.s32.totalorder %s352_s6, %s588_s7  ;;  %p594_p4 = scmp.lt.s32.totalorder %s588_s7, %s588_s7 }
  0x2a   :  { %491 = vmatprep.mubr.bf16.mxu0 %v536_v4  ;;  %499 = vmatprep.mubr.bf16.mxu1 %v537_v5  ;;  %v539_v11 = vld [vmem:[#allocation2 + $0x28] sm:$0xff]   ;;  %v540_v12 = vld [vmem:[#allocation2 + $0x10] sm:$0xff]   ;;  %v542_v14 = vld [vmem:[#allocation2 + $0x18] sm:$0xff]  }
  0x2b   :  { %v541_v13 = vld [vmem:[#allocation2 + $0x30] sm:$0xff]   ;;  %v543_v15 = vld [vmem:[#allocation2 + $0x38] sm:$0xff]   ;;  %p595_p5 = por %p594_p4, %p593_p3 }
  0x2c   :  { %478 = vmatpush3.bf16.msra.mxu0 %v529_v1  ;;  %516 = vmatpush3.bf16.msra.mxu1 %v529_v1 }
  0x2d   :  { %479 = vmatprep.subr.bf16.mxu0 %v530_v2  ;;  %509 = vmatprep.subr.bf16.mxu1 %v530_v2  ;;  %p596_p6 = pnand %p595_p5, %p589_p2 }
  0x30   :  { %480 = vmatpush3.bf16.msra.mxu0 %v530_v2  ;;  %517 = vmatpush3.bf16.msra.mxu1 %v530_v2 }
  0x31   :  { %481 = vmatprep.subr.bf16.mxu0 %v531_v3  ;;  %510 = vmatprep.subr.bf16.mxu1 %v531_v3 }
  0x34   :  { %482 = vmatpush3.bf16.msra.mxu0 %v531_v3  ;;  %518 = vmatpush3.bf16.msra.mxu1 %v531_v3 }
  0x35   :  { %483 = vmatprep.subr.bf16.mxu0 %v532_v6  ;;  %511 = vmatprep.subr.bf16.mxu1 %v532_v6 }
  0x38   :  { %484 = vmatpush3.bf16.msra.mxu0 %v532_v6  ;;  %519 = vmatpush3.bf16.msra.mxu1 %v532_v6 }
  0x39   :  { %485 = vmatprep.subr.bf16.mxu0 %v533_v7  ;;  %512 = vmatprep.subr.bf16.mxu1 %v533_v7 }
  0x3c   :  { %486 = vmatpush3.bf16.msra.mxu0 %v533_v7  ;;  %520 = vmatpush3.bf16.msra.mxu1 %v533_v7 }
  0x3d   :  { %487 = vmatprep.subr.bf16.mxu0 %v534_v8  ;;  %513 = vmatprep.subr.bf16.mxu1 %v534_v8 }
  0x40   :  { %488 = vmatpush3.bf16.msra.mxu0 %v534_v8  ;;  %521 = vmatpush3.bf16.msra.mxu1 %v534_v8 }
  0x41   :  { %489 = vmatprep.subr.bf16.mxu0 %v535_v9  ;;  %514 = vmatprep.subr.bf16.mxu1 %v535_v9 }
  0x44   :  { %490 = vmatpush3.bf16.msra.mxu0 %v535_v9  ;;  %522 = vmatpush3.bf16.msra.mxu1 %v535_v9 }
  0x47   :  { %492 = vmatmul.mubr.bf16.vlgmr.msra.gmra.mrb[0].mxu0 %v538_v10  ;;  %500 = vmatmul.mubr.bf16.vlgmr.msra.gmra.mrb[0].mxu1 %v539_v11 }
  0x48   :  { %495 = vmatprep.mubr.bf16.mxu0 %v540_v12  ;;  %503 = vmatprep.mubr.bf16.mxu1 %v541_v13 }
  0x4f   :  { %496 = vmatmul.mubr.bf16.gmra.mrb[4].mxu0 %v542_v14  ;;  %504 = vmatmul.mubr.bf16.gmra.mrb[4].mxu1 %v543_v15 }
 0x11a   :  { %v493_v16 = vpop.f32.mrb[0].mxu0  ;;  %v501_v17 = vpop.f32.mrb[0].mxu1 }
 0x11b   :  { %v203_v18 = vpop.f32.mrb[1].mxu0  ;;  %v235_v19 = vpop.f32.mrb[1].mxu1 }
 0x11c   :  { %v494_v20 = vpop.f32.mrb[2].mxu0  ;;  %v502_v21 = vpop.f32.mrb[2].mxu1 }
 0x11d   :  { %v420_v22 = vpack.c.bf16 %v494_v20, %v493_v16  ;;  %v440_v23 = vpack.c.bf16 %v502_v21, %v501_v17  ;;  %v206_v24 = vpop.f32.mrb[3].mxu0  ;;  %v238_v25 = vpop.f32.mrb[3].mxu1 }
 0x11e   :  { %v415_v26 = vpack.c.bf16 %v206_v24, %v203_v18  ;;  %v435_v27 = vpack.c.bf16 %v238_v25, %v235_v19 }
 0x11f   :  { %452 = vst [vmem:[#allocation7 + $0x8] sm:$0xff] %v420_v22   ;;  %456 = vst [vmem:[#allocation7 + $0x28] sm:$0xff] %v440_v23  }
 0x120   :  { %416 = vst [vmem:[#allocation7] sm:$0xff] %v415_v26   ;;  %455 = vst [vmem:[#allocation7 + $0x20] sm:$0xff] %v435_v27  }
 0x122   :  { %v497_v28 = vpop.f32.mrb[4].mxu0  ;;  %v505_v29 = vpop.f32.mrb[4].mxu1 }
 0x123   :  { %v219_v30 = vpop.f32.mrb[5].mxu0  ;;  %v251_v31 = vpop.f32.mrb[5].mxu1 }
 0x124   :  { %v498_v32 = vpop.f32.mrb[6].mxu0  ;;  %v506_v33 = vpop.f32.mrb[6].mxu1 }
 0x125   :  { %v430_v34 = vpack.c.bf16 %v498_v32, %v497_v28  ;;  %v450_v35 = vpack.c.bf16 %v506_v33, %v505_v29  ;;  %v222_v36 = vpop.f32.mrb[7].mxu0  ;;  %v254_v37 = vpop.f32.mrb[7].mxu1 }
 0x126   :  { %v425_v38 = vpack.c.bf16 %v222_v36, %v219_v30  ;;  %v445_v39 = vpack.c.bf16 %v254_v37, %v251_v31 }
 0x127   :  { %454 = vst [vmem:[#allocation7 + $0x18] sm:$0xff] %v430_v34   ;;  %458 = vst [vmem:[#allocation7 + $0x38] sm:$0xff] %v450_v35  }
 0x128   :  { %453 = vst [vmem:[#allocation7 + $0x10] sm:$0xff] %v425_v38   ;;  %457 = vst [vmem:[#allocation7 + $0x30] sm:$0xff] %v445_v39  }
 0x129   :  { %599 = shalt.err (!%p596_p6)
}
 0x12a   :  { %s600_s10 = scalar_lea.hbm %s683_s2, 1024 }
 0x12b   :  { %p601_p7 = scmp.ne.s32.totalorder %s683_s2, %s600_s10  ;;  %p604_p8 = scmp.lt.u32.totalorder %s600_s10, %s683_s2 }
 0x12d   :  { %p606_p9 = pnand %p604_p8, %p601_p7 }
 0x12f   :  { %609 = shalt.err (!%p606_p9)
}
 0x130   :  { %357 = dma.vmem_to_hbm [thread:$0]  %s352_s6, 1024, %s683_s2, [#allocation4], %s617_s19, %s617_s19, %s618_s20  }
 0x131   :  { %614 = dma.done.wait [#allocation4], 1024  }
 0x132   :  { %615 = vsyncadd [#allocation4], 4294966272 }
 0x133   :  { %361 = vsyncpa [#allocation3], 1 }
 0x134   :  { %362 = vsyncpa [#allocation6], 1 }
 0x135   :  { %363 = vsyncpa [#allocation4], 1 }

</bundles_post_ra>
